<compile_context>
chip_gen: v6e
topology: v6e:2x2x1
jax: 0.10.0
libtpu: 0.0.40
codegen_flags: <defaults>
</compile_context>

<pallas_src>
import functools

import jax
import jax.numpy as jnp
from jax.experimental import pallas as pl
from jax.experimental.pallas import tpu as pltpu

# Atom feature cardinalities from get_atom_feature_dims().
ATOM_FEATURE_DIMS = (119, 4, 12, 12, 10, 6, 6, 2, 2)
NUM_FEATS = len(ATOM_FEATURE_DIMS)
TOTAL_ROWS = sum(ATOM_FEATURE_DIMS)        # 173
ORIG_OFFSETS = tuple(sum(ATOM_FEATURE_DIMS[:i]) for i in range(NUM_FEATS))

HALF = 128                                  # lanes per K-half of the MXU contraction
# Segment-to-half assignment: each feature fits entirely in one 128-lane half.
LO_FEATS = (0, 1, 7, 8)                     # 119 + 4 + 2 + 2 = 127 rows
HI_FEATS = (2, 3, 4, 5, 6)                  # 12 + 12 + 10 + 6 + 6 = 46 rows


def _half_offsets(feats):
    offs, acc = [], 0
    for f in feats:
        offs.append(acc)
        acc += ATOM_FEATURE_DIMS[f]
    return tuple(offs), acc


LO_OFFSETS, LO_ROWS = _half_offsets(LO_FEATS)   # (0, 119, 123, 125), 127
HI_OFFSETS, HI_ROWS = _half_offsets(HI_FEATS)   # (0, 12, 24, 34, 40), 46
assert LO_ROWS <= HALF and HI_ROWS <= HALF


def _round_up(x, m):
    return (x + m - 1) // m * m


def _num_tensorcores_per_chip():
    """Best-effort: 2 TensorCores on v7x / v4 / v5p, else 1."""
    try:
        kind = jax.devices()[0].device_kind.lower()
    except Exception:
        return 1
    for tag in ("v7", "7x", "v4", "v5p"):
        if tag in kind:
            return 2
    return 1


def _atom_encoder_kernel(idx_ref, table_ref, out_ref):
    # idx_ref:   (tile_n, 9)        int32
    # table_ref: (256, emb_dim)     float32 (reordered, zero-padded segments)
    # out_ref:   (tile_n, emb_dim)  float32
    idx = idx_ref[...]
    tile_n = idx.shape[0]
    lane = jax.lax.broadcasted_iota(jnp.int32, (tile_n, HALF), 1)

    def build_half(feats, offsets):
        # Segments are disjoint -> boolean OR == sum; convert once at the end.
        hot = lane == (idx[:, feats[0]:feats[0] + 1] + offsets[0])
        for f, off in zip(feats[1:], offsets[1:]):
            hot = hot | (lane == (idx[:, f:f + 1] + off))
        return hot.astype(jnp.float32)                      # exact 0/1

    # Lo half first: its MXU matmul overlaps with building the hi half on the VPU.
    acc = jnp.dot(build_half(LO_FEATS, LO_OFFSETS), table_ref[0:HALF, :],
                  preferred_element_type=jnp.float32)
    acc = acc + jnp.dot(build_half(HI_FEATS, HI_OFFSETS), table_ref[HALF:2 * HALF, :],
                        preferred_element_type=jnp.float32)
    out_ref[...] = acc


def _reorder_table(table_f32):
    """[173, D] original-order concat table -> [256, D] (lo half | hi half)."""
    def gather(feats):
        segs = [table_f32[ORIG_OFFSETS[f]:ORIG_OFFSETS[f] + ATOM_FEATURE_DIMS[f]]
                for f in feats]
        block = jnp.concatenate(segs, axis=0)
        return jnp.pad(block, ((0, HALF - block.shape[0]), (0, 0)))
    return jnp.concatenate([gather(LO_FEATS), gather(HI_FEATS)], axis=0)


@functools.partial(jax.jit, static_argnames=("tile_n",))
def atom_encoder(x_idx, table, *, tile_n=2048):
    """x_idx: [N, 9] int32; table: [173, emb_dim] f32 concat table (original order)."""
    n, f = x_idx.shape
    assert f == NUM_FEATS
    rows, emb_dim = table.shape
    assert rows == TOTAL_ROWS

    # Tile sizing: never exceed the (padded) data; on single-TC chips a small N
    # runs as one big tile; on 2-TC chips keep >= 2 grid steps for megacore.
    cores = _num_tensorcores_per_chip()
    max_tile = _round_up(n, 8)
    if cores > 1 and n > 8:
        max_tile = min(max_tile, max(8, _round_up(pl.cdiv(n, cores), 8)))
    tile_n = _round_up(max(8, min(int(tile_n), max_tile)), 8)
    n_pad = _round_up(n, tile_n)
    grid = (n_pad // tile_n,)

    # Pad rows of x with zeros (index 0 is valid everywhere); sliced off below.
    if n_pad != n:
        x_idx = jnp.pad(x_idx, ((0, n_pad - n), (0, 0)))

    table_p = _reorder_table(table.astype(jnp.float32))      # (256, emb_dim) f32

    # Per-step VMEM estimate with actual dtypes / buffer counts.
    vmem_est = (2 * tile_n * 128 * 4            # idx tiles (int32, lane-padded), x2 buffers
                + 2 * 2 * HALF * emb_dim * 4    # resident f32 table, worst case x2 buffers
                + 2 * tile_n * emb_dim * 4      # f32 out tiles, x2 buffers
                + 4 * tile_n * HALF * 4         # multihot halves / bool temporaries
                + tile_n * emb_dim * 4)         # f32 accumulator
    vmem_limit = None if vmem_est < (12 << 20) else int(min(vmem_est + (4 << 20), 96 << 20))

    out = pl.pallas_call(
        _atom_encoder_kernel,
        out_shape=jax.ShapeDtypeStruct((n_pad, emb_dim), jnp.float32),
        grid_spec=pltpu.PrefetchScalarGridSpec(
            num_scalar_prefetch=0,
            grid=grid,
            in_specs=[
                pl.BlockSpec((tile_n, NUM_FEATS), lambda i: (i, 0)),
                pl.BlockSpec((2 * HALF, emb_dim), lambda i: (0, 0)),
            ],
            out_specs=pl.BlockSpec((tile_n, emb_dim), lambda i: (i, 0)),
        ),
        compiler_params=pltpu.CompilerParams(
            dimension_semantics=("parallel",),
            vmem_limit_bytes=vmem_limit),
    )(x_idx, table_p)

    if n_pad != n:
        out = out[:n]
    return out


def init_atom_embedding_table(key, emb_dim):
    """Xavier-uniform init per embedding table, concatenated row-wise: [173, emb_dim]."""
    tables = []
    for i, dim in enumerate(ATOM_FEATURE_DIMS):
        k = jax.random.fold_in(key, i)
        bound = (6.0 / (dim + emb_dim)) ** 0.5
        tables.append(jax.random.uniform(k, (dim, emb_dim), jnp.float32,
                                         minval=-bound, maxval=bound))
    return jnp.concatenate(tables, axis=0)


def atom_encoder_ref(x_idx, table):
    """Pure-JAX reference: sum of per-feature embedding lookups (original order)."""
    out = jnp.zeros((x_idx.shape[0], table.shape[1]), jnp.float32)
    for i in range(NUM_FEATS):
        out = out + table[x_idx[:, i] + ORIG_OFFSETS[i]]
    return out


if __name__ == "__main__":
    key = jax.random.PRNGKey(0)
    emb_dim = 32
    n_atoms = 50          # deliberately not a multiple of the tile size

    table = init_atom_embedding_table(key, emb_dim)          # [173, 32] f32

    # Deterministic integer node features, each column within its cardinality.
    idx_cols = []
    for i, dim in enumerate(ATOM_FEATURE_DIMS):
        k = jax.random.fold_in(key, 100 + i)
        idx_cols.append(jax.random.randint(k, (n_atoms, 1), 0, dim, jnp.int32))
    x_idx = jnp.concatenate(idx_cols, axis=1)                 # [50, 9] int32

    out = jax.block_until_ready(atom_encoder(x_idx, table))
    assert out.shape == (n_atoms, emb_dim)

    # f32 table + exact 0/1 multihot: matches the f32 PyTorch module up to
    # matmul accumulation-order rounding (in practice ~1e-6); tolerance kept
    # generous so the check is robust across MXU f32 lowering variants.
    ref = atom_encoder_ref(x_idx, table)
    assert jnp.allclose(out, ref, atol=2e-2, rtol=2e-2), \
        float(jnp.max(jnp.abs(out - ref)))

    print("KERNEL_OK")
</pallas_src>

<mosaic_0001>
module attributes {stable_mosaic.version = 11 : i64} {
  func.func @_atom_encoder_kernel(%arg0: i32, %arg1: memref<56x9xi32, #tpu.memory_space<vmem>>, %arg2: memref<256x32xf32, #tpu.memory_space<vmem>>, %arg3: memref<56x32xf32, #tpu.memory_space<vmem>>) attributes {dimension_semantics = [#tpu.dimension_semantics<parallel>], iteration_bounds = array<i64: 1>, scalar_prefetch = 0 : i64, scratch_operands = 0 : i64, tpu.core_type = #tpu.core_type<tc>, window_params = [{transform_indices = @transform_0, window_bounds = array<i64: 56, 9>}, {pipeline_mode = #tpu.pipeline_mode<synchronous>, transform_indices = @transform_1, window_bounds = array<i64: 256, 32>}, {transform_indices = @transform_2, window_bounds = array<i64: 56, 32>}]} {
    %c0 = arith.constant 0 : index
    %c0_0 = arith.constant 0 : index
    %0 = vector.load %arg1[%c0, %c0_0] : memref<56x9xi32, #tpu.memory_space<vmem>>, vector<56x9xi32>
    %1 = tpu.iota {dimensions = array<i32: 1>} : vector<56x128xi32>
    %2 = vector.extract_strided_slice %0 {offsets = [0, 0], sizes = [56, 1], strides = [1, 1]} : vector<56x9xi32> to vector<56x1xi32>
    %c0_i32 = arith.constant 0 : i32
    %3 = vector.broadcast %c0_i32 : i32 to vector<56x1xi32>
    %4 = arith.addi %2, %3 : vector<56x1xi32>
    %5 = vector.broadcast %4 : vector<56x1xi32> to vector<56x128xi32>
    %6 = arith.cmpi eq, %1, %5 : vector<56x128xi32>
    %7 = vector.extract_strided_slice %0 {offsets = [0, 1], sizes = [56, 1], strides = [1, 1]} : vector<56x9xi32> to vector<56x1xi32>
    %c119_i32 = arith.constant 119 : i32
    %8 = vector.broadcast %c119_i32 : i32 to vector<56x1xi32>
    %9 = arith.addi %7, %8 : vector<56x1xi32>
    %10 = vector.broadcast %9 : vector<56x1xi32> to vector<56x128xi32>
    %11 = arith.cmpi eq, %1, %10 : vector<56x128xi32>
    %12 = arith.ori %6, %11 : vector<56x128xi1>
    %13 = vector.extract_strided_slice %0 {offsets = [0, 7], sizes = [56, 1], strides = [1, 1]} : vector<56x9xi32> to vector<56x1xi32>
    %c123_i32 = arith.constant 123 : i32
    %14 = vector.broadcast %c123_i32 : i32 to vector<56x1xi32>
    %15 = arith.addi %13, %14 : vector<56x1xi32>
    %16 = vector.broadcast %15 : vector<56x1xi32> to vector<56x128xi32>
    %17 = arith.cmpi eq, %1, %16 : vector<56x128xi32>
    %18 = arith.ori %12, %17 : vector<56x128xi1>
    %19 = vector.extract_strided_slice %0 {offsets = [0, 8], sizes = [56, 1], strides = [1, 1]} : vector<56x9xi32> to vector<56x1xi32>
    %c125_i32 = arith.constant 125 : i32
    %20 = vector.broadcast %c125_i32 : i32 to vector<56x1xi32>
    %21 = arith.addi %19, %20 : vector<56x1xi32>
    %22 = vector.broadcast %21 : vector<56x1xi32> to vector<56x128xi32>
    %23 = arith.cmpi eq, %1, %22 : vector<56x128xi32>
    %24 = arith.ori %18, %23 : vector<56x128xi1>
    %25 = arith.extui %24 : vector<56x128xi1> to vector<56x128xi32>
    %26 = arith.sitofp %25 : vector<56x128xi32> to vector<56x128xf32>
    %c0_1 = arith.constant 0 : index
    %c0_2 = arith.constant 0 : index
    %27 = vector.load %arg2[%c0_1, %c0_2] : memref<256x32xf32, #tpu.memory_space<vmem>>, vector<128x32xf32>
    %cst = arith.constant dense<0.000000e+00> : vector<56x32xf32>
    %28 = tpu.matmul %26, %27, %cst {dimension_numbers = #tpu.dot_dimension_numbers<[1], [0], [0], [1], [0, 0, 1, 1], [], []>} : vector<56x128xf32>, vector<128x32xf32>, vector<56x32xf32> -> vector<56x32xf32>
    %29 = vector.extract_strided_slice %0 {offsets = [0, 2], sizes = [56, 1], strides = [1, 1]} : vector<56x9xi32> to vector<56x1xi32>
    %c0_i32_3 = arith.constant 0 : i32
    %30 = vector.broadcast %c0_i32_3 : i32 to vector<56x1xi32>
    %31 = arith.addi %29, %30 : vector<56x1xi32>
    %32 = vector.broadcast %31 : vector<56x1xi32> to vector<56x128xi32>
    %33 = arith.cmpi eq, %1, %32 : vector<56x128xi32>
    %34 = vector.extract_strided_slice %0 {offsets = [0, 3], sizes = [56, 1], strides = [1, 1]} : vector<56x9xi32> to vector<56x1xi32>
    %c12_i32 = arith.constant 12 : i32
    %35 = vector.broadcast %c12_i32 : i32 to vector<56x1xi32>
    %36 = arith.addi %34, %35 : vector<56x1xi32>
    %37 = vector.broadcast %36 : vector<56x1xi32> to vector<56x128xi32>
    %38 = arith.cmpi eq, %1, %37 : vector<56x128xi32>
    %39 = arith.ori %33, %38 : vector<56x128xi1>
    %40 = vector.extract_strided_slice %0 {offsets = [0, 4], sizes = [56, 1], strides = [1, 1]} : vector<56x9xi32> to vector<56x1xi32>
    %c24_i32 = arith.constant 24 : i32
    %41 = vector.broadcast %c24_i32 : i32 to vector<56x1xi32>
    %42 = arith.addi %40, %41 : vector<56x1xi32>
    %43 = vector.broadcast %42 : vector<56x1xi32> to vector<56x128xi32>
    %44 = arith.cmpi eq, %1, %43 : vector<56x128xi32>
    %45 = arith.ori %39, %44 : vector<56x128xi1>
    %46 = vector.extract_strided_slice %0 {offsets = [0, 5], sizes = [56, 1], strides = [1, 1]} : vector<56x9xi32> to vector<56x1xi32>
    %c34_i32 = arith.constant 34 : i32
    %47 = vector.broadcast %c34_i32 : i32 to vector<56x1xi32>
    %48 = arith.addi %46, %47 : vector<56x1xi32>
    %49 = vector.broadcast %48 : vector<56x1xi32> to vector<56x128xi32>
    %50 = arith.cmpi eq, %1, %49 : vector<56x128xi32>
    %51 = arith.ori %45, %50 : vector<56x128xi1>
    %52 = vector.extract_strided_slice %0 {offsets = [0, 6], sizes = [56, 1], strides = [1, 1]} : vector<56x9xi32> to vector<56x1xi32>
    %c40_i32 = arith.constant 40 : i32
    %53 = vector.broadcast %c40_i32 : i32 to vector<56x1xi32>
    %54 = arith.addi %52, %53 : vector<56x1xi32>
    %55 = vector.broadcast %54 : vector<56x1xi32> to vector<56x128xi32>
    %56 = arith.cmpi eq, %1, %55 : vector<56x128xi32>
    %57 = arith.ori %51, %56 : vector<56x128xi1>
    %58 = arith.extui %57 : vector<56x128xi1> to vector<56x128xi32>
    %59 = arith.sitofp %58 : vector<56x128xi32> to vector<56x128xf32>
    %c128 = arith.constant 128 : index
    %c0_4 = arith.constant 0 : index
    %60 = vector.load %arg2[%c128, %c0_4] : memref<256x32xf32, #tpu.memory_space<vmem>>, vector<128x32xf32>
    %cst_5 = arith.constant dense<0.000000e+00> : vector<56x32xf32>
    %61 = tpu.matmul %59, %60, %cst_5 {dimension_numbers = #tpu.dot_dimension_numbers<[1], [0], [0], [1], [0, 0, 1, 1], [], []>} : vector<56x128xf32>, vector<128x32xf32>, vector<56x32xf32> -> vector<56x32xf32>
    %62 = arith.addf %28, %61 : vector<56x32xf32>
    %c0_6 = arith.constant 0 : index
    %c0_7 = arith.constant 0 : index
    %63 = vector.load %arg3[%c0_6, %c0_7] : memref<56x32xf32, #tpu.memory_space<vmem>>, vector<56x32xf32>
    tpu.vector_store %arg3[%c0_6, %c0_7], %62 {strides = array<i32>} : memref<56x32xf32, #tpu.memory_space<vmem>>, vector<56x32xf32>,
    return
  }
  func.func @transform_0(%arg0: i32) -> (i32, i32) {
    %c0_i32 = arith.constant 0 : i32
    %c0_i32_0 = arith.constant 0 : i32
    return %arg0, %c0_i32 : i32, i32
  }
  func.func @transform_1(%arg0: i32) -> (i32, i32) {
    %c0_i32 = arith.constant 0 : i32
    %c0_i32_0 = arith.constant 0 : i32
    %c0_i32_1 = arith.constant 0 : i32
    return %c0_i32, %c0_i32_0 : i32, i32
  }
  func.func @transform_2(%arg0: i32) -> (i32, i32) {
    %c0_i32 = arith.constant 0 : i32
    %c0_i32_0 = arith.constant 0 : i32
    return %arg0, %c0_i32 : i32, i32
  }
}

</mosaic_0001>

<bundles_post_ra>
// kernel: atom_encoder.1
= control target key start
LH: loop header
LB: loop body
LE: loop exit
PB: predicated region body
PF: predicated region fallthrough
CT: control target
= control target key end

     0   :  { %v874_v0 = vmov 2   ;;  %v875_v1 = vmov 0   ;;  %v876_v6 = vmov 4   ;;  %v877_v7 = vmov 3   ;;  %s1365_s0 = inlined_call_operand.vmem [shape: s32[56,9], index: 0, kind: input, shape index: {}]   ;;  %s1366_s1 = inlined_call_operand.vmem [shape: f32[256,32], index: 1, kind: input, shape index: {}]   ;;  %s1367_s2 = inlined_call_operand.vmem [shape: f32[56,32], index: 2, kind: output, shape index: {}]  }
   0x1   :  { %827 = vset.pattern.permute.xlu0 %v874_v0  ;;  %829 = vset.pattern.permute.xlu1 %v875_v1  ;;  %v906_v2 = vld [vmem:[%s1365_s0] sm:$0xff]  ;;  %v915_v5 = vld [vmem:[%s1365_s0 + $0x8] sm:$0xff]  ;;  %v923_v10 = vld [vmem:[%s1365_s0 + $0x10] sm:$0xff]  ;;  %v878_v11 = vmov 1   ;;  %v879_v16 = vmov 0.0   ;;  %v880_v18 = vmov 7  }
   0x2   :  { %21 = vperm.xlu1 %829, %v906_v2   ;;  %205 = vperm.xlu0 %827, %v906_v2   ;;  %v274_v3 = vadd.s32 24, %v906_v2  ;;  %v232_v4 = vadd.s32 12, %v906_v2  ;;  %v275_v8 = vadd.s32 24, %v915_v5  ;;  %v48_v9 = vadd.s32 119, %v906_v2  ;;  %v429_v12 = vld [vmem:[%s1366_s1 + $0xf8] sm:$0xff]  ;;  %v428_v17 = vld [vmem:[%s1366_s1 + $0xf0] sm:$0xff] }
   0x3   :  { %v276_v13 = vadd.s32 24, %v923_v10  ;;  %v90_v14 = vadd.s32 123, %v906_v2  ;;  %v934_v15 = vld [vmem:[%s1365_s0 + $0x18] sm:$0xff]  ;;  %709 = vmatprep.subr.mxu0 %v879_v16  ;;  %762 = vmatprep.subr.mxu1 %v879_v16  ;;  %v427_v20 = vld [vmem:[%s1366_s1 + $0xe8] sm:$0xff]  ;;  %v950_v21 = vld [vmem:[%s1365_s0 + $0x20] sm:$0xff]  ;;  %v358_v22 = vadd.s32 40, %v906_v2 }
   0x4   :  { %710 = vmatpush3.msra.mxu0 %v429_v12  ;;  %v277_v19 = vadd.s32 24, %v934_v15  ;;  %v426_v23 = vld [vmem:[%s1366_s1 + $0xe0] sm:$0xff]  ;;  %v278_v24 = vadd.s32 24, %v950_v21  ;;  %v425_v25 = vld [vmem:[%s1366_s1 + $0xd8] sm:$0xff]  ;;  %v881_v26 = vmov 6   ;;  %v966_v27 = vld [vmem:[%s1365_s0 + $0x28] sm:$0xff] }
   0x5   :  { %711 = vmatprep.subr.mxu0 %v879_v16  ;;  %v424_v28 = vld [vmem:[%s1366_s1 + $0xd0] sm:$0xff]  ;;  %v279_v29 = vadd.s32 24, %v966_v27  ;;  %v423_v30 = vld [vmem:[%s1366_s1 + $0xc8] sm:$0xff]  ;;  %v422_v32 = vld [vmem:[%s1366_s1 + $0xc0] sm:$0xff]  ;;  %v233_v34 = vadd.s32 12, %v915_v5  ;;  %v316_v38 = vadd.s32 34, %v906_v2 }
   0x6   :  { %830 = vset.pattern.permute.xlu1 %v876_v6  ;;  %828 = vset.pattern.permute.xlu0 %v877_v7  ;;  %v980_v31 = vld [vmem:[%s1365_s0 + $0x30] sm:$0xff]  ;;  %v421_v35 = vld [vmem:[%s1366_s1 + $0xb8] sm:$0xff]  ;;  %v419_v40 = vld [vmem:[%s1366_s1 + $0xa8] sm:$0xff]  ;;  %v882_v41 = vmov 5   ;;  %v317_v42 = vadd.s32 34, %v915_v5  ;;  %v49_v45 = vadd.s32 119, %v915_v5 }
   0x7   :  { %282 = vperm.xlu1 %830, %v274_v3   ;;  %240 = vperm.xlu0 %828, %v232_v4   ;;  %v280_v33 = vadd.s32 24, %v980_v31  ;;  %v420_v36 = vld [vmem:[%s1366_s1 + $0xb0] sm:$0xff]  ;;  %v203_v37 = vld [vmem:[%s1366_s1 + $0x78] sm:$0xff]  ;;  %v418_v43 = vld [vmem:[%s1366_s1 + $0xa0] sm:$0xff]  ;;  %vm883_vm0 = vmmov 0   ;;  %v318_v47 = vadd.s32 34, %v923_v10 }
   0x8   :  { %712 = vmatpush3.msra.mxu0 %v428_v17  ;;  %763 = vmatpush3.msra.mxu1 %v203_v37  ;;  %v202_v39 = vld [vmem:[%s1366_s1 + $0x70] sm:$0xff]  ;;  %v201_v44 = vld [vmem:[%s1366_s1 + $0x68] sm:$0xff]  ;;  %v417_v46 = vld [vmem:[%s1366_s1 + $0x98] sm:$0xff]  ;;  %v91_v50 = vadd.s32 123, %v915_v5  ;;  %v319_v52 = vadd.s32 34, %v934_v15  ;;  %v359_v55 = vadd.s32 40, %v915_v5 }
   0x9   :  { %713 = vmatprep.subr.mxu0 %v879_v16  ;;  %764 = vmatprep.subr.mxu1 %v879_v16  ;;  %v200_v48 = vld [vmem:[%s1366_s1 + $0x60] sm:$0xff]  ;;  %v416_v49 = vld [vmem:[%s1366_s1 + $0x90] sm:$0xff]  ;;  %v415_v51 = vld [vmem:[%s1366_s1 + $0x88] sm:$0xff]  ;;  %v320_v56 = vadd.s32 34, %v950_v21  ;;  %v321_v59 = vadd.s32 34, %v966_v27  ;;  %v322_v62 = vadd.s32 34, %v980_v31 }
   0xa   :  { %714 = vmatpush3.msra.mxu0 %v427_v20  ;;  %765 = vmatpush3.msra.mxu1 %v202_v39  ;;  %v414_v53 = vld [vmem:[%s1366_s1 + $0x80] sm:$0xff]  ;;  %v199_v54 = vld [vmem:[%s1366_s1 + $0x58] sm:$0xff]  ;;  %v198_v57 = vld [vmem:[%s1366_s1 + $0x50] sm:$0xff]  ;;  %v234_v63 = vadd.s32 12, %v923_v10  ;;  %v133_v12 = vadd.s32 125, %v915_v5  ;;  %v134_v17 = vadd.s32 125, %v923_v10 }
   0xb   :  { %831 = vset.pattern.permute.xlu1 %v878_v11  ;;  %836 = vset.pattern.permute.xlu0 %v876_v6  ;;  %v197_v58 = vld [vmem:[%s1366_s1 + $0x48] sm:$0xff]  ;;  %v196_v60 = vld [vmem:[%s1366_s1 + $0x40] sm:$0xff]  ;;  %v195_v61 = vld [vmem:[%s1366_s1 + $0x38] sm:$0xff]  ;;  %v132_v6 = vadd.s32 125, %v906_v2  ;;  %v92_v20 = vadd.s32 123, %v923_v10 }
   0xc   :  { %285 = vperm.xlu0 %836, %v275_v8   ;;  %56 = vperm.xlu1 %831, %v48_v9   ;;  %v194_v3 = vld [vmem:[%s1366_s1 + $0x30] sm:$0xff]  ;;  %v193_v4 = vld [vmem:[%s1366_s1 + $0x28] sm:$0xff]  ;;  %v192_v8 = vld [vmem:[%s1366_s1 + $0x20] sm:$0xff]  ;;  %v884_v9 = vmov 8  }
   0xd   :  { %715 = vmatprep.subr.mxu0 %v879_v16  ;;  %741 = vmatprep.mubr.msk.f32.mxu0 %vm883_vm0, %v879_v16  ;;  %v191_v2 = vld [vmem:[%s1366_s1 + $0x18] sm:$0xff] }
   0xe   :  { %716 = vmatpush3.msra.mxu0 %v426_v23  ;;  %766 = vmatprep.subr.mxu1 %v879_v16  ;;  %v360_v23 = vadd.s32 40, %v923_v10 }
   0xf   :  { %717 = vmatprep.subr.mxu0 %v879_v16  ;;  %767 = vmatpush3.msra.mxu1 %v201_v44 }
  0x10   :  { %288 = vperm.xlu0 %836, %v276_v13   ;;  %832 = vset.pattern.permute.xlu1 %v880_v18  ;;  %v50_v13 = vadd.s32 119, %v923_v10 }
  0x11   :  { %98 = vperm.xlu1 %832, %v90_v14   ;;  %718 = vmatpush3.msra.mxu0 %v425_v25  ;;  %v190_v14 = vld [vmem:[%s1366_s1 + $0x10] sm:$0xff]  ;;  %v137_v25 = vadd.s32 125, %v966_v27 }
  0x12   :  { %719 = vmatprep.subr.mxu0 %v879_v16  ;;  %768 = vmatprep.subr.mxu1 %v879_v16 }
  0x13   :  { %720 = vmatpush3.msra.mxu0 %v424_v28  ;;  %769 = vmatpush3.msra.mxu1 %v200_v48  ;;  %v138_v28 = vadd.s32 125, %v980_v31  ;;  %v18_v48 = vlaneseq }
  0x14   :  { %291 = vperm.xlu0 %836, %v277_v19   ;;  %721 = vmatprep.subr.mxu0 %v879_v16  ;;  %v188_v19 = vld [vmem:[%s1366_s1] sm:$0xff] }
  0x15   :  { %833 = vset.pattern.permute.xlu1 %v881_v26  ;;  %722 = vmatpush3.msra.mxu0 %v423_v30  ;;  %v93_v30 = vadd.s32 123, %v934_v15 }
  0x16   :  { %366 = vperm.xlu1 %833, %v358_v22   ;;  %723 = vmatprep.subr.mxu0 %v879_v16  ;;  %v135_v22 = vadd.s32 125, %v934_v15 }
  0x17   :  { %724 = vmatpush3.msra.mxu0 %v422_v32  ;;  %770 = vmatprep.subr.mxu1 %v879_v16  ;;  %v361_v32 = vadd.s32 40, %v934_v15 }
  0x18   :  { %294 = vperm.xlu0 %836, %v278_v24   ;;  %725 = vmatprep.subr.mxu0 %v879_v16  ;;  %v136_v24 = vadd.s32 125, %v950_v21 }
  0x19   :  { %726 = vmatpush3.msra.mxu0 %v421_v35  ;;  %771 = vmatpush3.msra.mxu1 %v199_v54 }
  0x1a   :  { %834 = vset.pattern.permute.xlu1 %v874_v0  ;;  %727 = vmatprep.subr.mxu0 %v879_v16 }
  0x1b   :  { %208 = vperm.xlu1 %834, %v915_v5   ;;  %728 = vmatpush3.msra.mxu0 %v420_v36 }
  0x1c   :  { %297 = vperm.xlu0 %836, %v279_v29   ;;  %729 = vmatprep.subr.mxu0 %v879_v16  ;;  %v235_v29 = vadd.s32 12, %v934_v15 }
  0x1d   :  { %730 = vmatpush3.msra.mxu0 %v419_v40  ;;  %794 = vmatprep.mubr.msk.f32.mxu1 %vm883_vm0, %v879_v16 }
  0x1e   :  { %731 = vmatprep.subr.mxu0 %v879_v16  ;;  %772 = vmatprep.subr.mxu1 %v879_v16 }
  0x1f   :  { %835 = vset.pattern.permute.xlu1 %v877_v7  ;;  %732 = vmatpush3.msra.mxu0 %v418_v43 }
  0x20   :  { %300 = vperm.xlu0 %836, %v280_v33   ;;  %243 = vperm.xlu1 %835, %v233_v34   ;;  %v236_v33 = vadd.s32 12, %v950_v21 }
  0x21   :  { %733 = vmatprep.subr.mxu0 %v879_v16  ;;  %773 = vmatpush3.msra.mxu1 %v198_v57 }
  0x22   :  { %734 = vmatpush3.msra.mxu0 %v417_v46  ;;  %774 = vmatprep.subr.mxu1 %v879_v16 }
  0x23   :  { %735 = vmatprep.subr.mxu0 %v879_v16  ;;  %775 = vmatpush3.msra.mxu1 %v197_v58 }
  0x24   :  { %867 = vset.pattern.permute.xlu0 %v882_v41  ;;  %837 = vset.pattern.permute.xlu1 %v875_v1  ;;  %v362_v41 = vadd.s32 40, %v950_v21 }
  0x25   :  { %324 = vperm.xlu0 %867, %v316_v38   ;;  %24 = vperm.xlu1 %837, %v915_v5   ;;  %v189_v5 = vld [vmem:[%s1366_s1 + $0x8] sm:$0xff]  ;;  %v94_v38 = vadd.s32 123, %v950_v21 }
  0x26   :  { %736 = vmatpush3.msra.mxu0 %v416_v49  ;;  %776 = vmatprep.subr.mxu1 %v879_v16 }
  0x27   :  { %737 = vmatprep.subr.mxu0 %v879_v16  ;;  %777 = vmatpush3.msra.mxu1 %v196_v60 }
  0x28   :  { %738 = vmatpush3.msra.mxu0 %v415_v51  ;;  %778 = vmatprep.subr.mxu1 %v879_v16 }
  0x29   :  { %327 = vperm.xlu0 %867, %v317_v42   ;;  %838 = vset.pattern.permute.xlu1 %v878_v11 }
  0x2a   :  { %59 = vperm.xlu1 %838, %v49_v45   ;;  %739 = vmatprep.subr.mxu0 %v879_v16 }
  0x2b   :  { %740 = vmatpush3.msra.mxu0 %v414_v53  ;;  %779 = vmatpush3.msra.mxu1 %v195_v61  ;;  %v53_v53 = vadd.s32 119, %v966_v27  ;;  %v363_v61 = vadd.s32 40, %v966_v27 }
  0x2c   :  { %780 = vmatprep.subr.mxu1 %v879_v16 }
  0x2d   :  { %330 = vperm.xlu0 %867, %v318_v47   ;;  %781 = vmatpush3.msra.mxu1 %v194_v3  ;;  %v237_v47 = vadd.s32 12, %v966_v27 }
  0x2e   :  { %839 = vset.pattern.permute.xlu1 %v880_v18  ;;  %782 = vmatprep.subr.mxu1 %v879_v16 }
  0x2f   :  { %101 = vperm.xlu1 %839, %v91_v50   ;;  %783 = vmatpush3.msra.mxu1 %v193_v4  ;;  %v1168_v50 = vand.u32 127, %v18_v48 }
  0x30   :  { %784 = vmatprep.subr.mxu1 %v879_v16 }
  0x31   :  { %333 = vperm.xlu0 %867, %v319_v52   ;;  %785 = vmatpush3.msra.mxu1 %v192_v8 }
  0x32   :  { %786 = vmatprep.subr.mxu1 %v879_v16 }
  0x33   :  { %840 = vset.pattern.permute.xlu1 %v881_v26  ;;  %787 = vmatpush3.msra.mxu1 %v191_v2  ;;  %v54_v2 = vadd.s32 119, %v980_v31 }
  0x34   :  { %369 = vperm.xlu1 %840, %v359_v55   ;;  %788 = vmatprep.subr.mxu1 %v879_v16 }
  0x35   :  { %336 = vperm.xlu0 %867, %v320_v56   ;;  %789 = vmatpush3.msra.mxu1 %v190_v14  ;;  %v95_v56 = vadd.s32 123, %v966_v27 }
  0x36   :  { %790 = vmatprep.subr.mxu1 %v879_v16 }
  0x37   :  { %791 = vmatpush3.msra.mxu1 %v189_v5 }
  0x38   :  { %841 = vset.pattern.permute.xlu1 %v874_v0  ;;  %792 = vmatprep.subr.mxu1 %v879_v16 }
  0x39   :  { %339 = vperm.xlu0 %867, %v321_v59   ;;  %211 = vperm.xlu1 %841, %v923_v10  }
  0x3a   :  { %793 = vmatpush3.msra.mxu1 %v188_v19  ;;  %v364_v19 = vadd.s32 40, %v980_v31 }
  0x3d   :  { %342 = vperm.xlu0 %867, %v322_v62   ;;  %842 = vset.pattern.permute.xlu1 %v877_v7 }
  0x3e   :  { %246 = vperm.xlu1 %842, %v234_v63  }
  0x41   :  { %870 = vset.pattern.permute.xlu0 %v884_v9 }
  0x42   :  { %140 = vperm.xlu0 %870, %v132_v6   ;;  %843 = vset.pattern.permute.xlu1 %v875_v1  ;;  %v238_v6 = vadd.s32 12, %v980_v31 }
  0x43   :  { %27 = vperm.xlu1 %843, %v923_v10   ;;  %v51_v10 = vadd.s32 119, %v934_v15 }
  0x46   :  { %143 = vperm.xlu0 %870, %v133_v12  }
  0x47   :  { %844 = vset.pattern.permute.xlu1 %v878_v11 }
  0x48   :  { %62 = vperm.xlu1 %844, %v50_v13  }
  0x4a   :  { %146 = vperm.xlu0 %870, %v134_v17   ;;  %v96_v17 = vadd.s32 123, %v980_v31 }
  0x4c   :  { %845 = vset.pattern.permute.xlu1 %v880_v18 }
  0x4d   :  { %104 = vperm.xlu1 %845, %v92_v20  }
  0x4e   :  { %149 = vperm.xlu0 %870, %v135_v22  }
  0x51   :  { %846 = vset.pattern.permute.xlu1 %v881_v26 }
  0x52   :  { %372 = vperm.xlu1 %846, %v360_v23   ;;  %152 = vperm.xlu0 %870, %v136_v24  }
  0x56   :  { %847 = vset.pattern.permute.xlu1 %v874_v0  ;;  %155 = vperm.xlu0 %870, %v137_v25  }
  0x57   :  { %214 = vperm.xlu1 %847, %v934_v15  }
  0x5a   :  { %158 = vperm.xlu0 %870, %v138_v28  }
  0x5b   :  { %848 = vset.pattern.permute.xlu1 %v877_v7 }
  0x5c   :  { %249 = vperm.xlu1 %848, %v235_v29  }
  0x5e   :  { %873 = vset.pattern.permute.xlu0 %v881_v26 }
  0x60   :  { %849 = vset.pattern.permute.xlu1 %v875_v1 }
  0x61   :  { %30 = vperm.xlu1 %849, %v934_v15   ;;  %v52_v15 = vadd.s32 119, %v950_v21 }
  0x65   :  { %850 = vset.pattern.permute.xlu1 %v878_v11 }
  0x66   :  { %65 = vperm.xlu1 %850, %v51_v10  }
  0x6a   :  { %851 = vset.pattern.permute.xlu1 %v880_v18 }
  0x6b   :  { %107 = vperm.xlu1 %851, %v93_v30  }
  0x6f   :  { %852 = vset.pattern.permute.xlu1 %v881_v26 }
  0x70   :  { %375 = vperm.xlu1 %852, %v361_v32  }
  0x74   :  { %853 = vset.pattern.permute.xlu1 %v874_v0 }
  0x75   :  { %217 = vperm.xlu1 %853, %v950_v21  }
  0x79   :  { %854 = vset.pattern.permute.xlu1 %v877_v7 }
  0x7a   :  { %252 = vperm.xlu1 %854, %v236_v33  }
  0x7d   :  { %v1142_v34 = vpop.permute.xlu1 %21  ;;  %v206_v35 = vpop.permute.xlu0 %205 }
  0x7e   :  { %855 = vset.pattern.permute.xlu1 %v875_v1  ;;  %vm225_vm1 = vcmp.eq.s32.totalorder %v1168_v50, %v206_v35 }
  0x7f   :  { %33 = vperm.xlu1 %855, %v950_v21  }
  0x82   :  { %v283_v36 = vpop.permute.xlu1 %282  ;;  %v241_v37 = vpop.permute.xlu0 %240 }
  0x83   :  { %856 = vset.pattern.permute.xlu1 %v878_v11  ;;  %vm260_vm2 = vcmp.eq.s32.totalorder %v1168_v50, %v241_v37  ;;  %vm302_vm3 = vcmp.eq.s32.totalorder %v1168_v50, %v283_v36 }
  0x84   :  { %68 = vperm.xlu1 %856, %v52_v15   ;;  %vm267_vm4 = vmor %vm225_vm1, %vm260_vm2 }
  0x85   :  { %vm309_vm5 = vmor %vm267_vm4, %vm302_vm3 }
  0x87   :  { %v1149_v39 = vpop.permute.xlu1 %56  ;;  %v286_v40 = vpop.permute.xlu0 %285 }
  0x88   :  { %857 = vset.pattern.permute.xlu1 %v880_v18  ;;  %vm303_vm12 = vcmp.eq.s32.totalorder %v1168_v50, %v286_v40  ;;  %vm76_vm4 = vcmp.eq.s32.totalorder %v1168_v50, %v1149_v39 }
  0x89   :  { %110 = vperm.xlu1 %857, %v94_v38  }
  0x8b   :  { %v1153_v42 = vpop.permute.xlu0 %288 }
  0x8c   :  { %v1155_v43 = vpop.permute.xlu1 %98 }
  0x8d   :  { %858 = vset.pattern.permute.xlu1 %v881_v26 }
  0x8e   :  { %378 = vperm.xlu1 %858, %v362_v41  }
  0x8f   :  { %v1158_v44 = vpop.permute.xlu0 %291 }
  0x91   :  { %v367_v45 = vpop.permute.xlu1 %366 }
  0x92   :  { %859 = vset.pattern.permute.xlu1 %v874_v0  ;;  %vm386_vm7 = vcmp.eq.s32.totalorder %v1168_v50, %v367_v45 }
  0x93   :  { %220 = vperm.xlu1 %859, %v966_v27   ;;  %v1162_v46 = vpop.permute.xlu0 %294 }
  0x96   :  { %v209_v21 = vpop.permute.xlu1 %208 }
  0x97   :  { %860 = vset.pattern.permute.xlu1 %v877_v7  ;;  %v1166_v49 = vpop.permute.xlu0 %297  ;;  %vm226_vm11 = vcmp.eq.s32.totalorder %v1168_v50, %v209_v21 }
  0x98   :  { %255 = vperm.xlu1 %860, %v237_v47  }
  0x9b   :  { %v244_v51 = vpop.permute.xlu1 %243  ;;  %v1172_v52 = vpop.permute.xlu0 %300 }
  0x9c   :  { %861 = vset.pattern.permute.xlu1 %v875_v1  ;;  %vm261_vm10 = vcmp.eq.s32.totalorder %v1168_v50, %v244_v51 }
  0x9d   :  { %36 = vperm.xlu1 %861, %v966_v27   ;;  %vm268_vm13 = vmor %vm226_vm11, %vm261_vm10 }
  0x9e   :  { %vm310_vm15 = vmor %vm268_vm13, %vm303_vm12 }
  0xa0   :  { %v325_v54 = vpop.permute.xlu0 %324  ;;  %v1178_v55 = vpop.permute.xlu1 %24 }
  0xa1   :  { %vm344_vm6 = vcmp.eq.s32.totalorder %v1168_v50, %v325_v54  ;;  %862 = vset.pattern.permute.xlu1 %v878_v11  ;;  %vm42_vm13 = vcmp.eq.s32.totalorder %v1168_v50, %v1178_v55 }
  0xa2   :  { %vm351_vm8 = vmor %vm309_vm5, %vm344_vm6  ;;  %71 = vperm.xlu1 %862, %v53_v53   ;;  %vm118_vm5 = vcmp.eq.s32.totalorder %v1168_v50, %v1155_v43  ;;  %vm41_vm6 = vcmp.eq.s32.totalorder %v1168_v50, %v1142_v34 }
  0xa3   :  { %vm393_vm9 = vmor %vm351_vm8, %vm386_vm7 }
  0xa4   :  { %v328_v57 = vpop.permute.xlu0 %327  ;;  %v649_v58 = vsel %vm393_vm9, 1.0, %v879_v16  ;;  %vm83_vm7 = vmor %vm41_vm6, %vm76_vm4 }
  0xa5   :  { %742 = vmatmul.mubr.f32.vlgmr.msra.gmra.mxu0 %v649_v58  ;;  %v60_v59 = vpop.permute.xlu1 %59  ;;  %vm345_vm14 = vcmp.eq.s32.totalorder %v1168_v50, %v328_v57  ;;  %vm125_vm8 = vmor %vm83_vm7, %vm118_vm5  ;;  %vm304_vm5 = vcmp.eq.s32.totalorder %v1168_v50, %v1153_v42 }
  0xa6   :  { %863 = vset.pattern.permute.xlu1 %v880_v18  ;;  %744 = vmatprep.mubr.msk.f32.mxu0 %vm883_vm0, %v879_v16  ;;  %vm352_vm1 = vmor %vm310_vm15, %vm345_vm14  ;;  %vm77_vm9 = vcmp.eq.s32.totalorder %v1168_v50, %v60_v59 }
  0xa7   :  { %113 = vperm.xlu1 %863, %v95_v56   ;;  %vm84_vm14 = vmor %vm42_vm13, %vm77_vm9 }
  0xa8   :  { %v1188_v60 = vpop.permute.xlu0 %330 }
  0xaa   :  { %v102_v62 = vpop.permute.xlu1 %101 }
  0xab   :  { %864 = vset.pattern.permute.xlu1 %v881_v26  ;;  %vm119_vm11 = vcmp.eq.s32.totalorder %v1168_v50, %v102_v62 }
  0xac   :  { %381 = vperm.xlu1 %864, %v363_v61   ;;  %v1195_v63 = vpop.permute.xlu0 %333  ;;  %vm126_vm15 = vmor %vm84_vm14, %vm119_vm11  ;;  %vm346_vm14 = vcmp.eq.s32.totalorder %v1168_v50, %v1188_v60 }
  0xaf   :  { %v370_v3 = vpop.permute.xlu1 %369 }
  0xb0   :  { %vm387_vm2 = vcmp.eq.s32.totalorder %v1168_v50, %v370_v3  ;;  %865 = vset.pattern.permute.xlu1 %v874_v0  ;;  %v1200_v27 = vpop.permute.xlu0 %336 }
  0xb1   :  { %vm394_vm3 = vmor %vm352_vm1, %vm387_vm2  ;;  %223 = vperm.xlu1 %865, %v980_v31  }
  0xb2   :  { %v650_v4 = vsel %vm394_vm3, 1.0, %v879_v16 }
  0xb3   :  { %745 = vmatmul.mubr.f32.gmra.mxu0 %v650_v4 }
  0xb4   :  { %v212_v8 = vpop.permute.xlu1 %211  ;;  %v1205_v9 = vpop.permute.xlu0 %339  ;;  %747 = vmatprep.mubr.msk.f32.mxu0 %vm883_vm0, %v879_v16 }
  0xb5   :  { %866 = vset.pattern.permute.xlu1 %v877_v7  ;;  %vm227_vm4 = vcmp.eq.s32.totalorder %v1168_v50, %v212_v8 }
  0xb6   :  { %258 = vperm.xlu1 %866, %v238_v6  }
  0xb8   :  { %v1210_v0 = vpop.permute.xlu0 %342 }
  0xb9   :  { %v247_v12 = vpop.permute.xlu1 %246 }
  0xba   :  { %868 = vset.pattern.permute.xlu1 %v875_v1  ;;  %v885_v1 = vmov 1.0   ;;  %vm262_vm1 = vcmp.eq.s32.totalorder %v1168_v50, %v247_v12 }
  0xbb   :  { %39 = vperm.xlu1 %868, %v980_v31   ;;  %vm269_vm6 = vmor %vm227_vm4, %vm262_vm1 }
  0xbd   :  { %v141_v7 = vpop.permute.xlu0 %140 }
  0xbe   :  { %vm160_vm10 = vcmp.eq.s32.totalorder %v1168_v50, %v141_v7  ;;  %v28_v13 = vpop.permute.xlu1 %27 }
  0xbf   :  { %vm167_vm12 = vmor %vm125_vm8, %vm160_vm10  ;;  %869 = vset.pattern.permute.xlu1 %v878_v11  ;;  %vm43_vm9 = vcmp.eq.s32.totalorder %v1168_v50, %v28_v13 }
  0xc0   :  { %74 = vperm.xlu1 %869, %v54_v2   ;;  %795 = vmatmul.mubr.msk.f32.vlgmr.msra.gmra.mxu1 %vm167_vm12, %v885_v1  ;;  %vm311_vm8 = vmor %vm269_vm6, %vm304_vm5  ;;  %vm305_vm6 = vcmp.eq.s32.totalorder %v1168_v50, %v1158_v44 }
  0xc1   :  { %v144_v14 = vpop.permute.xlu0 %143  ;;  %797 = vmatprep.mubr.msk.f32.mxu1 %vm883_vm0, %v879_v16  ;;  %vm353_vm1 = vmor %vm311_vm8, %vm346_vm14 }
  0xc2   :  { %vm161_vm2 = vcmp.eq.s32.totalorder %v1168_v50, %v144_v14 }
  0xc3   :  { %vm168_vm3 = vmor %vm126_vm15, %vm161_vm2  ;;  %v63_v11 = vpop.permute.xlu1 %62 }
  0xc4   :  { %871 = vset.pattern.permute.xlu1 %v880_v18  ;;  %798 = vmatmul.mubr.msk.f32.gmra.mxu1 %vm168_vm3, %v885_v1  ;;  %vm78_vm7 = vcmp.eq.s32.totalorder %v1168_v50, %v63_v11 }
  0xc5   :  { %116 = vperm.xlu1 %871, %v96_v17   ;;  %v147_v5 = vpop.permute.xlu0 %146  ;;  %800 = vmatprep.mubr.msk.f32.mxu1 %vm883_vm0, %v879_v16  ;;  %vm85_vm11 = vmor %vm43_vm9, %vm78_vm7 }
  0xc6   :  { %vm162_vm10 = vcmp.eq.s32.totalorder %v1168_v50, %v147_v5 }
  0xc8   :  { %v105_v20 = vpop.permute.xlu1 %104 }
  0xc9   :  { %vm120_vm12 = vcmp.eq.s32.totalorder %v1168_v50, %v105_v20  ;;  %872 = vset.pattern.permute.xlu1 %v881_v26  ;;  %v150_v25 = vpop.permute.xlu0 %149 }
  0xca   :  { %vm127_vm13 = vmor %vm85_vm11, %vm120_vm12  ;;  %384 = vperm.xlu1 %872, %v364_v19   ;;  %vm163_vm11 = vcmp.eq.s32.totalorder %v1168_v50, %v150_v25 }
  0xcb   :  { %vm169_vm15 = vmor %vm127_vm13, %vm162_vm10 }
  0xcc   :  { %801 = vmatmul.mubr.msk.f32.gmra.mxu1 %vm169_vm15, %v885_v1  ;;  %vm347_vm15 = vcmp.eq.s32.totalorder %v1168_v50, %v1195_v63 }
  0xcd   :  { %v373_v18 = vpop.permute.xlu1 %372  ;;  %803 = vmatprep.mubr.msk.f32.mxu1 %vm883_vm0, %v879_v16  ;;  %v153_v15 = vpop.permute.xlu0 %152 }
  0xce   :  { %vm388_vm2 = vcmp.eq.s32.totalorder %v1168_v50, %v373_v18 }
  0xcf   :  { %vm395_vm3 = vmor %vm353_vm1, %vm388_vm2 }
  0xd0   :  { %v651_v31 = vsel %vm395_vm3, 1.0, %v879_v16 }
  0xd1   :  { %748 = vmatmul.mubr.f32.gmra.mxu0 %v651_v31  ;;  %v156_v44 = vpop.permute.xlu0 %155 }
  0xd2   :  { %v215_v26 = vpop.permute.xlu1 %214  ;;  %750 = vmatprep.mubr.msk.f32.mxu0 %vm883_vm0, %v879_v16 }
  0xd3   :  { %vm228_vm5 = vcmp.eq.s32.totalorder %v1168_v50, %v215_v26 }
  0xd5   :  { %v159_v54 = vpop.permute.xlu0 %158 }
  0xd7   :  { %v250_v22 = vpop.permute.xlu1 %249 }
  0xd8   :  { %vm263_vm4 = vcmp.eq.s32.totalorder %v1168_v50, %v250_v22 }
  0xd9   :  { %vm270_vm7 = vmor %vm228_vm5, %vm263_vm4  ;;  %vm306_vm5 = vcmp.eq.s32.totalorder %v1168_v50, %v1162_v46 }
  0xda   :  { %vm312_vm9 = vmor %vm270_vm7, %vm305_vm6  ;;  %vm348_vm6 = vcmp.eq.s32.totalorder %v1168_v50, %v1200_v27 }
  0xdb   :  { %vm354_vm2 = vmor %vm312_vm9, %vm347_vm15 }
  0xdc   :  { %v31_v23 = vpop.permute.xlu1 %30 }
  0xdd   :  { %vm44_vm10 = vcmp.eq.s32.totalorder %v1168_v50, %v31_v23 }
  0xe1   :  { %v66_v24 = vpop.permute.xlu1 %65 }
  0xe2   :  { %vm79_vm8 = vcmp.eq.s32.totalorder %v1168_v50, %v66_v24 }
  0xe3   :  { %vm86_vm12 = vmor %vm44_vm10, %vm79_vm8 }
  0xe6   :  { %v108_v28 = vpop.permute.xlu1 %107 }
  0xe7   :  { %vm121_vm13 = vcmp.eq.s32.totalorder %v1168_v50, %v108_v28 }
  0xe8   :  { %vm128_vm14 = vmor %vm86_vm12, %vm121_vm13 }
  0xe9   :  { %vm170_vm1 = vmor %vm128_vm14, %vm163_vm11  ;;  %vm164_vm14 = vcmp.eq.s32.totalorder %v1168_v50, %v153_v15 }
  0xea   :  { %804 = vmatmul.mubr.msk.f32.gmra.mxu1 %vm170_vm1, %v885_v1 }
  0xeb   :  { %v376_v29 = vpop.permute.xlu1 %375  ;;  %806 = vmatprep.mubr.msk.f32.mxu1 %vm883_vm0, %v879_v16 }
  0xec   :  { %vm389_vm3 = vcmp.eq.s32.totalorder %v1168_v50, %v376_v29 }
  0xed   :  { %vm396_vm4 = vmor %vm354_vm2, %vm389_vm3 }
  0xee   :  { %v652_v10 = vsel %vm396_vm4, 1.0, %v879_v16 }
  0xef   :  { %751 = vmatmul.mubr.f32.gmra.mxu0 %v652_v10 }
  0xf0   :  { %v218_v30 = vpop.permute.xlu1 %217  ;;  %753 = vmatprep.mubr.msk.f32.mxu0 %vm883_vm0, %v879_v16 }
  0xf1   :  { %vm229_vm7 = vcmp.eq.s32.totalorder %v1168_v50, %v218_v30 }
  0xf5   :  { %v253_v32 = vpop.permute.xlu1 %252 }
  0xf6   :  { %vm264_vm8 = vcmp.eq.s32.totalorder %v1168_v50, %v253_v32 }
  0xf7   :  { %vm271_vm9 = vmor %vm229_vm7, %vm264_vm8  ;;  %vm307_vm8 = vcmp.eq.s32.totalorder %v1168_v50, %v1166_v49 }
  0xf8   :  { %vm313_vm10 = vmor %vm271_vm9, %vm306_vm5 }
  0xf9   :  { %vm1278_vm11 = vmor %vm313_vm10, %vm348_vm6  ;;  %vm349_vm10 = vcmp.eq.s32.totalorder %v1168_v50, %v1205_v9 }
  0xfa   :  { %v34_v34 = vpop.permute.xlu1 %33 }
  0xfb   :  { %vm45_vm13 = vcmp.eq.s32.totalorder %v1168_v50, %v34_v34 }
  0xff   :  { %v69_v35 = vpop.permute.xlu1 %68 }
 0x100   :  { %vm80_vm12 = vcmp.eq.s32.totalorder %v1168_v50, %v69_v35 }
 0x101   :  { %vm87_vm15 = vmor %vm45_vm13, %vm80_vm12 }
 0x104   :  { %v111_v36 = vpop.permute.xlu1 %110 }
 0x105   :  { %vm122_vm1 = vcmp.eq.s32.totalorder %v1168_v50, %v111_v36 }
 0x106   :  { %vm129_vm2 = vmor %vm87_vm15, %vm122_vm1  ;;  %vm165_vm15 = vcmp.eq.s32.totalorder %v1168_v50, %v156_v44 }
 0x107   :  { %vm171_vm3 = vmor %vm129_vm2, %vm164_vm14 }
 0x108   :  { %807 = vmatmul.mubr.msk.f32.gmra.mxu1 %vm171_vm3, %v885_v1 }
 0x109   :  { %v379_v37 = vpop.permute.xlu1 %378  ;;  %809 = vmatprep.mubr.msk.f32.mxu1 %vm883_vm0, %v879_v16 }
 0x10a   :  { %vm390_vm4 = vcmp.eq.s32.totalorder %v1168_v50, %v379_v37 }
 0x10b   :  { %vm397_vm5 = vmor %vm1278_vm11, %vm390_vm4 }
 0x10c   :  { %v653_v38 = vsel %vm397_vm5, 1.0, %v879_v16 }
 0x10d   :  { %754 = vmatmul.mubr.f32.gmra.mxu0 %v653_v38 }
 0x10e   :  { %v221_v39 = vpop.permute.xlu1 %220  ;;  %756 = vmatprep.mubr.msk.f32.mxu0 %vm883_vm0, %v879_v16 }
 0x10f   :  { %vm230_vm6 = vcmp.eq.s32.totalorder %v1168_v50, %v221_v39 }
 0x113   :  { %v256_v40 = vpop.permute.xlu1 %255 }
 0x114   :  { %vm265_vm7 = vcmp.eq.s32.totalorder %v1168_v50, %v256_v40 }
 0x115   :  { %vm272_vm9 = vmor %vm230_vm6, %vm265_vm7 }
 0x116   :  { %vm314_vm11 = vmor %vm272_vm9, %vm307_vm8  ;;  %vm308_vm9 = vcmp.eq.s32.totalorder %v1168_v50, %v1172_v52 }
 0x117   :  { %vm1301_vm12 = vmor %vm314_vm11, %vm349_vm10  ;;  %vm350_vm11 = vcmp.eq.s32.totalorder %v1168_v50, %v1210_v0 }
 0x118   :  { %v37_v42 = vpop.permute.xlu1 %36 }
 0x119   :  { %vm46_vm14 = vcmp.eq.s32.totalorder %v1168_v50, %v37_v42 }
 0x11d   :  { %v72_v43 = vpop.permute.xlu1 %71 }
 0x11e   :  { %vm81_vm13 = vcmp.eq.s32.totalorder %v1168_v50, %v72_v43 }
 0x11f   :  { %vm88_vm1 = vmor %vm46_vm14, %vm81_vm13 }
 0x122   :  { %v114_v45 = vpop.permute.xlu1 %113 }
 0x123   :  { %vm123_vm2 = vcmp.eq.s32.totalorder %v1168_v50, %v114_v45 }
 0x124   :  { %vm130_vm3 = vmor %vm88_vm1, %vm123_vm2  ;;  %vm166_vm2 = vcmp.eq.s32.totalorder %v1168_v50, %v159_v54 }
 0x125   :  { %vm172_vm4 = vmor %vm130_vm3, %vm165_vm15 }
 0x126   :  { %810 = vmatmul.mubr.msk.f32.gmra.mxu1 %vm172_vm4, %v885_v1 }
 0x127   :  { %v382_v46 = vpop.permute.xlu1 %381  ;;  %812 = vmatprep.mubr.msk.f32.mxu1 %vm883_vm0, %v879_v16 }
 0x128   :  { %vm391_vm5 = vcmp.eq.s32.totalorder %v1168_v50, %v382_v46 }
 0x129   :  { %vm398_vm6 = vmor %vm1301_vm12, %vm391_vm5 }
 0x12a   :  { %v654_v47 = vsel %vm398_vm6, 1.0, %v879_v16 }
 0x12b   :  { %757 = vmatmul.mubr.f32.gmra.mxu0 %v654_v47 }
 0x12c   :  { %v224_v48 = vpop.permute.xlu1 %223  ;;  %759 = vmatprep.mubr.msk.f32.mxu0 %vm883_vm0, %v879_v16 }
 0x12d   :  { %vm231_vm7 = vcmp.eq.s32.totalorder %v1168_v50, %v224_v48 }
 0x131   :  { %v259_v21 = vpop.permute.xlu1 %258 }
 0x132   :  { %vm266_vm8 = vcmp.eq.s32.totalorder %v1168_v50, %v259_v21 }
 0x133   :  { %vm273_vm10 = vmor %vm231_vm7, %vm266_vm8  ;;  %vm630_vm7 = vcmask 261120  }
 0x134   :  { %vm315_vm12 = vmor %vm273_vm10, %vm308_vm9 }
 0x135   :  { %vm1324_vm13 = vmor %vm315_vm12, %vm350_vm11 }
 0x136   :  { %v40_v51 = vpop.permute.xlu1 %39 }
 0x137   :  { %vm47_vm14 = vcmp.eq.s32.totalorder %v1168_v50, %v40_v51 }
 0x13b   :  { %v75_v53 = vpop.permute.xlu1 %74 }
 0x13c   :  { %vm82_vm0 = vcmp.eq.s32.totalorder %v1168_v50, %v75_v53 }
 0x13d   :  { %vm89_vm15 = vmor %vm47_vm14, %vm82_vm0 }
 0x140   :  { %v117_v55 = vpop.permute.xlu1 %116 }
 0x141   :  { %vm124_vm1 = vcmp.eq.s32.totalorder %v1168_v50, %v117_v55 }
 0x142   :  { %vm131_vm3 = vmor %vm89_vm15, %vm124_vm1 }
 0x143   :  { %vm173_vm4 = vmor %vm131_vm3, %vm166_vm2 }
 0x144   :  { %813 = vmatmul.mubr.msk.f32.gmra.mxu1 %vm173_vm4, %v885_v1 }
 0x145   :  { %v385_v52 = vpop.permute.xlu1 %384 }
 0x146   :  { %vm392_vm5 = vcmp.eq.s32.totalorder %v1168_v50, %v385_v52 }
 0x147   :  { %vm399_vm6 = vmor %vm1324_vm13, %vm392_vm5 }
 0x148   :  { %v655_v56 = vsel %vm399_vm6, 1.0, %v879_v16 }
 0x149   :  { %760 = vmatmul.mubr.f32.gmra.mxu0 %v655_v56 }
 0x165   :  { %v496_v57 = vpop.f32.mrf.mxu0 }
 0x167   :  { %v743_v58 = vpop.f32.mrf.mxu0 }
 0x173   :  { %v501_v59 = vpop.f32.mrf.mxu0 }
 0x175   :  { %v746_v60 = vpop.f32.mrf.mxu0 }
 0x180   :  { %v596_v61 = vpop.f32.mrf.mxu1 }
 0x181   :  { %v597_v62 = vadd.f32 %v596_v61, %v496_v57 }
 0x182   :  { %v796_v63 = vpop.f32.mrf.mxu1 }
 0x183   :  { %631 = vst.msk [vmem:[%s1367_s2] sm:$0xff] %vm630_vm7, %v597_v62 }
 0x184   :  { %v601_v50 = vpop.f32.mrf.mxu1 }
 0x185   :  { %v602_v3 = vadd.f32 %v601_v50, %v501_v59 }
 0x186   :  { %v799_v27 = vpop.f32.mrf.mxu1 }
 0x187   :  { %632 = vst.msk [vmem:[%s1367_s2 + $0x8] sm:$0xff] %vm630_vm7, %v602_v3 }
 0x18c   :  { %v606_v16 = vpop.f32.mrf.mxu1 }
 0x18e   :  { %v802_v4 = vpop.f32.mrf.mxu1 }
 0x191   :  { %v506_v6 = vpop.f32.mrf.mxu0 }
 0x192   :  { %v607_v8 = vadd.f32 %v606_v16, %v506_v6 }
 0x193   :  { %v749_v9 = vpop.f32.mrf.mxu0 }
 0x194   :  { %633 = vst.msk [vmem:[%s1367_s2 + $0x10] sm:$0xff] %vm630_vm7, %v607_v8 }
 0x1aa   :  { %v611_v0 = vpop.f32.mrf.mxu1 }
 0x1ac   :  { %v805_v12 = vpop.f32.mrf.mxu1 }
 0x1af   :  { %v511_v2 = vpop.f32.mrf.mxu0 }
 0x1b0   :  { %v612_v7 = vadd.f32 %v611_v0, %v511_v2 }
 0x1b1   :  { %v752_v13 = vpop.f32.mrf.mxu0 }
 0x1b2   :  { %634 = vst.msk [vmem:[%s1367_s2 + $0x18] sm:$0xff] %vm630_vm7, %v612_v7 }
 0x1c8   :  { %v616_v1 = vpop.f32.mrf.mxu1 }
 0x1ca   :  { %v808_v14 = vpop.f32.mrf.mxu1 }
 0x1cd   :  { %v516_v17 = vpop.f32.mrf.mxu0 }
 0x1ce   :  { %v617_v11 = vadd.f32 %v616_v1, %v516_v17 }
 0x1cf   :  { %v755_v5 = vpop.f32.mrf.mxu0 }
 0x1d0   :  { %635 = vst.msk [vmem:[%s1367_s2 + $0x20] sm:$0xff] %vm630_vm7, %v617_v11 }
 0x1e6   :  { %v621_v19 = vpop.f32.mrf.mxu1 }
 0x1e8   :  { %v811_v20 = vpop.f32.mrf.mxu1 }
 0x1eb   :  { %v521_v18 = vpop.f32.mrf.mxu0 }
 0x1ec   :  { %v622_v31 = vadd.f32 %v621_v19, %v521_v18 }
 0x1ed   :  { %v758_v26 = vpop.f32.mrf.mxu0 }
 0x1ee   :  { %636 = vst.msk [vmem:[%s1367_s2 + $0x28] sm:$0xff] %vm630_vm7, %v622_v31 }
 0x204   :  { %v626_v22 = vpop.f32.mrf.mxu1 }
 0x206   :  { %v814_v23 = vpop.f32.mrf.mxu1 }
 0x209   :  { %v526_v24 = vpop.f32.mrf.mxu0 }
 0x20a   :  { %v627_v25 = vadd.f32 %v626_v22, %v526_v24 }
 0x20b   :  { %v761_v28 = vpop.f32.mrf.mxu0 }
 0x20c   :  { %637 = vst.msk [vmem:[%s1367_s2 + $0x30] sm:$0xff] %vm630_vm7, %v627_v25 }

</bundles_post_ra>
